<compile_context>
chip_gen: v7x
topology: tpu7x:2x2x1
jax: 0.10.0
libtpu: 0.0.40
codegen_flags: <defaults>
</compile_context>

<pallas_src>
import functools
import math

import jax
import jax.numpy as jnp
from jax.experimental import pallas as pl
from jax.experimental.pallas import tpu as pltpu


def _round_up(x, m):
    return ((x + m - 1) // m) * m


# ---------------------------------------------------------------------------
# One-time feature probe: single-buffered constant blocks (pl.Buffered(1)).
# ---------------------------------------------------------------------------
_UNSET = object()
_single_buffer_mode_cache = _UNSET


def _single_buffer_mode():
    """Return pl.Buffered(1) if this JAX/Mosaic build supports single-buffered
    constant blocks (weights never change, so double buffering them is pure
    VMEM waste), else None.  Probed once with a tiny kernel, result cached."""
    global _single_buffer_mode_cache
    if _single_buffer_mode_cache is not _UNSET:
        return _single_buffer_mode_cache
    mode = None
    try:
        buffered = pl.Buffered(1)

        def _probe_kernel(w_ref, o_ref):
            o_ref[...] = w_ref[...] * 2.0

        probe = pl.pallas_call(
            _probe_kernel,
            out_shape=jax.ShapeDtypeStruct((16, 128), jnp.float32),
            grid=(2,),
            in_specs=[pl.BlockSpec((8, 128), lambda i: (0, 0),
                                   pipeline_mode=buffered)],
            out_specs=pl.BlockSpec((8, 128), lambda i: (i, 0)),
        )
        res = jax.block_until_ready(probe(jnp.ones((8, 128), jnp.float32)))
        if bool(jnp.all(res == 2.0)):
            mode = buffered
    except Exception:
        mode = None
    _single_buffer_mode_cache = mode
    return mode


def _vmem_budget_bytes():
    """~75% of physical VMEM (v7x: 64 MiB -> 48 MiB; v5e/v6e: 128 -> 96 MiB),
    leaving headroom for compiler scratch."""
    try:
        cap = int(pltpu.get_tpu_info().vmem_capacity_bytes)
    except Exception:
        cap = 64 << 20  # conservative fallback = smallest (v7x) VMEM
    return min((cap * 3) // 4, 100 << 20)


def _choose_batch_tile(B, tm_cap):
    """Batch tile: multiple of 8, <= tm_cap (VMEM bound), >= 2 grid steps when
    the batch allows it (both TensorCores fed on multi-core parts, DMAs can
    pipeline), and <= ~12.5% batch-padding waste."""
    if B <= 16:
        return _round_up(max(B, 1), 8)
    tm = 8
    cand = 16
    while cand <= min(tm_cap, 512):
        if 2 * cand > _round_up(B, 8):
            break                                   # would collapse to 1 step
        if 8 * (_round_up(B, cand) - B) <= B:       # waste <= 12.5%
            tm = cand
        cand *= 2
    return tm


# ---------------------------------------------------------------------------
# Fused MLP kernel: whole Linear->ReLU stack in one pallas_call.
# ---------------------------------------------------------------------------
def _mlp_fused_kernel(x_ref, *rest):
    """rest = (w_0, b_0, w_1, b_1, ..., w_{L-1}, b_{L-1}, o_ref).

    x_ref : (tm, K0)  f32 batch tile (un-padded K0)
    w_l   : (K_l, N_l) resident weight (bf16), N_l lane-dense (mult of 128)
    b_l   : (1,  N_l)  resident bias (f32)
    o_ref : (tm, N_L)  f32 output tile
    """
    o_ref = rest[-1]
    param_refs = rest[:-1]
    n_layers = len(param_refs) // 2

    h = x_ref[...]  # f32 activations; intermediates never touch HBM
    for l in range(n_layers):
        w = param_refs[2 * l][...]
        b = param_refs[2 * l + 1][...]
        acc = jnp.dot(h.astype(w.dtype), w,
                      preferred_element_type=jnp.float32)   # bf16 MXU, f32 acc
        h = jnp.maximum(acc + b, 0.0)                        # bias/ReLU in f32
    o_ref[...] = h.astype(o_ref.dtype)


def _mlp_forward(x, padded_params, *, out_dim, const_pipeline_mode):
    """x: (B, Din) f32.  padded_params: tuple of (w_padded_bf16, b_padded_f32)."""
    B, din = x.shape
    assert padded_params[0][0].shape[0] == din, "input feature dim mismatch"
    out_dims_p = [w.shape[1] for (w, _) in padded_params]
    dlp = out_dims_p[-1]

    def _nbytes(a):
        return int(a.size) * jnp.dtype(a.dtype).itemsize

    # ---- VMEM budget & resident-parameter guard --------------------------
    vmem_budget = _vmem_budget_bytes()
    buf_mult = 1 if const_pipeline_mode is not None else 2
    param_bytes = sum(_nbytes(w) + _nbytes(b) for (w, b) in padded_params) * buf_mult
    if param_bytes > vmem_budget - (8 << 20):
        # TODO(synk): add a K/N-tiled accumulator fallback (patterns P1+P3)
        # for encoders whose resident parameter stack exceeds VMEM.
        raise ValueError(
            f"Resident parameters need {param_bytes} bytes of VMEM, exceeding "
            f"the budget of {vmem_budget} bytes; a tiled fallback is required.")

    # ---- batch tile -------------------------------------------------------
    per_row = (2 * din * jnp.dtype(x.dtype).itemsize   # double-buffered input tile
               + 2 * dlp * 4                           # double-buffered output tile
               + 4 * max(out_dims_p + [din]) * 4)      # activation temporaries
    tm_cap = (vmem_budget - param_bytes - (4 << 20)) // per_row
    tm_cap = max(8, min(512, (int(tm_cap) // 8) * 8))
    tm = _choose_batch_tile(B, tm_cap)

    b_pad = _round_up(B, tm)
    x_p = x if b_pad == B else jnp.pad(x, ((0, b_pad - B), (0, 0)))
    grid = (b_pad // tm,)

    # ---- specs ------------------------------------------------------------
    def _const_spec(shape):
        if const_pipeline_mode is None:
            return pl.BlockSpec(shape, lambda i: (0, 0))
        return pl.BlockSpec(shape, lambda i: (0, 0),
                            pipeline_mode=const_pipeline_mode)

    in_specs = [pl.BlockSpec((tm, din), lambda i: (i, 0))]
    flat_params = []
    for (w, b) in padded_params:
        in_specs.append(_const_spec(w.shape))
        in_specs.append(_const_spec(b.shape))
        flat_params.extend([w, b])
    out_spec = pl.BlockSpec((tm, dlp), lambda i: (i, 0))

    flops = 2 * b_pad * sum(w.shape[0] * w.shape[1] for (w, _) in padded_params)
    bytes_accessed = (b_pad * din * jnp.dtype(x.dtype).itemsize
                      + sum(_nbytes(w) + _nbytes(b) for (w, b) in padded_params)
                      + b_pad * dlp * jnp.dtype(x.dtype).itemsize)
    cost = pl.CostEstimate(flops=flops, transcendentals=0,
                           bytes_accessed=bytes_accessed)

    out_p = pl.pallas_call(
        _mlp_fused_kernel,
        out_shape=jax.ShapeDtypeStruct((b_pad, dlp), x.dtype),
        grid=grid,
        in_specs=in_specs,
        out_specs=out_spec,
        compiler_params=pltpu.CompilerParams(
            dimension_semantics=("parallel",),
            vmem_limit_bytes=int(vmem_budget),
        ),
        cost_estimate=cost,
    )(x_p, *flat_params)

    if b_pad != B or dlp != out_dim:
        out_p = out_p[:B, :out_dim]
    return out_p


# ---------------------------------------------------------------------------
# Module wrapper
# ---------------------------------------------------------------------------
class NNEncoder:
    """JAX/Pallas port of the PyTorch NNEncoder (Linear -> ReLU stack)."""

    def __init__(self, input_size, output_size=64, hidden_sizes=(), key=None,
                 compute_dtype=jnp.bfloat16):
        self.input_size = int(input_size)
        self.hidden_sizes = tuple(hidden_sizes)
        self.output_size = int(output_size)
        self.compute_dtype = compute_dtype

        sizes = [self.input_size, *self.hidden_sizes, self.output_size]
        if key is None:
            key = jax.random.PRNGKey(0)

        self.params = []      # un-padded f32 (torch-equivalent) parameters
        padded = []           # kernel-ready: padded once, weights in bf16
        for i in range(len(sizes) - 1):
            in_f, out_f = sizes[i], sizes[i + 1]
            key, kw, kb = jax.random.split(key, 3)
            # torch.nn.Linear default init: U(-1/sqrt(in_f), 1/sqrt(in_f)).
            bound = 1.0 / math.sqrt(in_f)
            w = jax.random.uniform(kw, (in_f, out_f), jnp.float32, -bound, bound)
            b = jax.random.uniform(kb, (out_f,), jnp.float32, -bound, bound)
            self.params.append((w, b))

            # Pad ONCE here (not per forward).  First layer keeps its un-padded
            # K so x never needs feature-dim padding; every layer's output dim
            # is padded to a lane multiple (128) so activations / stores are
            # lane-dense.  Zero pad columns propagate as exact zeros.
            out_p = _round_up(out_f, 128)
            in_p = in_f if i == 0 else _round_up(in_f, 128)
            wp = jnp.pad(w, ((0, in_p - in_f), (0, out_p - out_f)))
            wp = wp.astype(compute_dtype)                              # bf16
            bp = jnp.pad(b, (0, out_p - out_f)).reshape(1, out_p)       # f32
            padded.append((wp, bp))
        self._padded_params = tuple(padded)

        self._forward = jax.jit(functools.partial(
            _mlp_forward,
            out_dim=self.output_size,
            const_pipeline_mode=_single_buffer_mode(),
        ))

    def __call__(self, inputs):
        lead = inputs.shape[:-1]
        x2 = inputs if inputs.ndim == 2 else inputs.reshape(-1, self.input_size)
        out = self._forward(x2, self._padded_params)
        if inputs.ndim != 2:
            out = out.reshape(*lead, self.output_size)
        return out


def _reference_forward(params, x, compute_dtype=jnp.bfloat16):
    """Pure-JAX reference using the same bf16-weight / f32-accumulate recipe."""
    h = x
    for (w, b) in params:
        acc = jnp.dot(h.astype(compute_dtype), w.astype(compute_dtype),
                      preferred_element_type=jnp.float32)
        h = jnp.maximum(acc + b, 0.0)
    return h


if __name__ == "__main__":
    key = jax.random.PRNGKey(0)
    k_in, k_params = jax.random.split(key)

    batch = 8
    input_size = 32
    hidden_sizes = (64,)
    output_size = 64

    x = jax.random.normal(k_in, (batch, input_size), dtype=jnp.float32)

    encoder = NNEncoder(input_size, output_size=output_size,
                        hidden_sizes=hidden_sizes, key=k_params)

    out = jax.block_until_ready(encoder(x))

    ref = _reference_forward(encoder.params, x)
    assert out.shape == (batch, output_size), out.shape
    assert out.dtype == x.dtype, out.dtype
    assert jnp.allclose(out, ref, atol=1e-2, rtol=1e-2), (
        f"max abs err {float(jnp.max(jnp.abs(out - ref)))}")

    print("KERNEL_OK")
</pallas_src>

<mosaic_0001>
module attributes {stable_mosaic.version = 11 : i64} {
  func.func @_probe_kernel(%arg0: i32, %arg1: memref<8x128xf32, #tpu.memory_space<vmem>>, %arg2: memref<8x128xf32, #tpu.memory_space<vmem>>) attributes {dimension_semantics = [#tpu.dimension_semantics<arbitrary>], iteration_bounds = array<i64: 2>, scalar_prefetch = 0 : i64, scratch_operands = 0 : i64, tpu.core_type = #tpu.core_type<tc>, window_params = [{pipeline_mode = #tpu.pipeline_mode<synchronous>, transform_indices = @transform_0, window_bounds = array<i64: 8, 128>}, {transform_indices = @transform_1, window_bounds = array<i64: 8, 128>}]} {
    %c0 = arith.constant 0 : index
    %c0_0 = arith.constant 0 : index
    %0 = vector.load %arg1[%c0, %c0_0] : memref<8x128xf32, #tpu.memory_space<vmem>>, vector<8x128xf32>
    %cst = arith.constant 2.000000e+00 : f32
    %1 = vector.broadcast %cst : f32 to vector<8x128xf32>
    %2 = arith.mulf %0, %1 : vector<8x128xf32>
    %c0_1 = arith.constant 0 : index
    %c0_2 = arith.constant 0 : index
    %3 = vector.load %arg2[%c0_1, %c0_2] : memref<8x128xf32, #tpu.memory_space<vmem>>, vector<8x128xf32>
    tpu.vector_store %arg2[%c0_1, %c0_2], %2 {strides = array<i32>} : memref<8x128xf32, #tpu.memory_space<vmem>>, vector<8x128xf32>,
    return
  }
  func.func @transform_0(%arg0: i32) -> (i32, i32) {
    %c0_i32 = arith.constant 0 : i32
    %c0_i32_0 = arith.constant 0 : i32
    %c0_i32_1 = arith.constant 0 : i32
    return %c0_i32, %c0_i32_0 : i32, i32
  }
  func.func @transform_1(%arg0: i32) -> (i32, i32) {
    %c0_i32 = arith.constant 0 : i32
    %c0_i32_0 = arith.constant 0 : i32
    return %arg0, %c0_i32 : i32, i32
  }
}

module attributes {stable_mosaic.version = 11 : i64} {
  func.func @_mlp_fused_kernel(%arg0: i32, %arg1: memref<8x32xf32, #tpu.memory_space<vmem>>, %arg2: memref<32x128xbf16, #tpu.memory_space<vmem>>, %arg3: memref<1x128xf32, #tpu.memory_space<vmem>>, %arg4: memref<128x128xbf16, #tpu.memory_space<vmem>>, %arg5: memref<1x128xf32, #tpu.memory_space<vmem>>, %arg6: memref<8x128xf32, #tpu.memory_space<vmem>>) attributes {dimension_semantics = [#tpu.dimension_semantics<parallel>], iteration_bounds = array<i64: 1>, scalar_prefetch = 0 : i64, scratch_operands = 0 : i64, tpu.core_type = #tpu.core_type<tc>, window_params = [{transform_indices = @transform_0, window_bounds = array<i64: 8, 32>}, {pipeline_mode = #tpu.pipeline_mode<synchronous>, transform_indices = @transform_1, window_bounds = array<i64: 32, 128>}, {pipeline_mode = #tpu.pipeline_mode<synchronous>, transform_indices = @transform_2, window_bounds = array<i64: 1, 128>}, {pipeline_mode = #tpu.pipeline_mode<synchronous>, transform_indices = @transform_3, window_bounds = array<i64: 128, 128>}, {pipeline_mode = #tpu.pipeline_mode<synchronous>, transform_indices = @transform_4, window_bounds = array<i64: 1, 128>}, {transform_indices = @transform_5, window_bounds = array<i64: 8, 128>}]} {
    %c0 = arith.constant 0 : index
    %c0_0 = arith.constant 0 : index
    %0 = vector.load %arg1[%c0, %c0_0] : memref<8x32xf32, #tpu.memory_space<vmem>>, vector<8x32xf32>
    %c0_1 = arith.constant 0 : index
    %c0_2 = arith.constant 0 : index
    %1 = vector.load %arg2[%c0_1, %c0_2] : memref<32x128xbf16, #tpu.memory_space<vmem>>, vector<32x128xbf16>
    %c0_3 = arith.constant 0 : index
    %c0_4 = arith.constant 0 : index
    %2 = vector.load %arg3[%c0_3, %c0_4] : memref<1x128xf32, #tpu.memory_space<vmem>>, vector<1x128xf32>
    %3 = arith.truncf %0 : vector<8x32xf32> to vector<8x32xbf16>
    %cst = arith.constant dense<0.000000e+00> : vector<8x128xf32>
    %4 = tpu.matmul %3, %1, %cst {dimension_numbers = #tpu.dot_dimension_numbers<[1], [0], [0], [1], [0, 0, 1, 1], [], []>} : vector<8x32xbf16>, vector<32x128xbf16>, vector<8x128xf32> -> vector<8x128xf32>
    %5 = vector.broadcast %2 : vector<1x128xf32> to vector<8x128xf32>
    %6 = arith.addf %4, %5 : vector<8x128xf32>
    %cst_5 = arith.constant 0.000000e+00 : f32
    %7 = vector.broadcast %cst_5 : f32 to vector<8x128xf32>
    %8 = arith.maximumf %6, %7 : vector<8x128xf32>
    %c0_6 = arith.constant 0 : index
    %c0_7 = arith.constant 0 : index
    %9 = vector.load %arg4[%c0_6, %c0_7] : memref<128x128xbf16, #tpu.memory_space<vmem>>, vector<128x128xbf16>
    %c0_8 = arith.constant 0 : index
    %c0_9 = arith.constant 0 : index
    %10 = vector.load %arg5[%c0_8, %c0_9] : memref<1x128xf32, #tpu.memory_space<vmem>>, vector<1x128xf32>
    %11 = arith.truncf %8 : vector<8x128xf32> to vector<8x128xbf16>
    %cst_10 = arith.constant dense<0.000000e+00> : vector<8x128xf32>
    %12 = tpu.matmul %11, %9, %cst_10 {dimension_numbers = #tpu.dot_dimension_numbers<[1], [0], [0], [1], [0, 0, 1, 1], [], []>} : vector<8x128xbf16>, vector<128x128xbf16>, vector<8x128xf32> -> vector<8x128xf32>
    %13 = vector.broadcast %10 : vector<1x128xf32> to vector<8x128xf32>
    %14 = arith.addf %12, %13 : vector<8x128xf32>
    %cst_11 = arith.constant 0.000000e+00 : f32
    %15 = vector.broadcast %cst_11 : f32 to vector<8x128xf32>
    %16 = arith.maximumf %14, %15 : vector<8x128xf32>
    %c0_12 = arith.constant 0 : index
    %c0_13 = arith.constant 0 : index
    %17 = vector.load %arg6[%c0_12, %c0_13] : memref<8x128xf32, #tpu.memory_space<vmem>>, vector<8x128xf32>
    tpu.vector_store %arg6[%c0_12, %c0_13], %16 {strides = array<i32>} : memref<8x128xf32, #tpu.memory_space<vmem>>, vector<8x128xf32>,
    return
  }
  func.func @transform_0(%arg0: i32) -> (i32, i32) {
    %c0_i32 = arith.constant 0 : i32
    %c0_i32_0 = arith.constant 0 : i32
    return %arg0, %c0_i32 : i32, i32
  }
  func.func @transform_1(%arg0: i32) -> (i32, i32) {
    %c0_i32 = arith.constant 0 : i32
    %c0_i32_0 = arith.constant 0 : i32
    %c0_i32_1 = arith.constant 0 : i32
    return %c0_i32, %c0_i32_0 : i32, i32
  }
  func.func @transform_2(%arg0: i32) -> (i32, i32) {
    %c0_i32 = arith.constant 0 : i32
    %c0_i32_0 = arith.constant 0 : i32
    %c0_i32_1 = arith.constant 0 : i32
    return %c0_i32, %c0_i32_0 : i32, i32
  }
  func.func @transform_3(%arg0: i32) -> (i32, i32) {
    %c0_i32 = arith.constant 0 : i32
    %c0_i32_0 = arith.constant 0 : i32
    %c0_i32_1 = arith.constant 0 : i32
    return %c0_i32, %c0_i32_0 : i32, i32
  }
  func.func @transform_4(%arg0: i32) -> (i32, i32) {
    %c0_i32 = arith.constant 0 : i32
    %c0_i32_0 = arith.constant 0 : i32
    %c0_i32_1 = arith.constant 0 : i32
    return %c0_i32, %c0_i32_0 : i32, i32
  }
  func.func @transform_5(%arg0: i32) -> (i32, i32) {
    %c0_i32 = arith.constant 0 : i32
    %c0_i32_0 = arith.constant 0 : i32
    return %arg0, %c0_i32 : i32, i32
  }
}

</mosaic_0001>

<bundles_post_ra>
// kernel: tpu_custom_call.1
= control target key start
LH: loop header
LB: loop body
LE: loop exit
PB: predicated region body
PF: predicated region fallthrough
CT: control target
= control target key end

     0   :  { %6 = vsyncpa [#allocation3], 0  ;;  %s482_s0 = inlined_call_operand.hbm [shape: f32[8,128], index: 0, kind: input, shape index: {}]   ;;  %s483_s1 = inlined_call_operand.hbm [shape: f32[16,128], index: 1, kind: output, shape index: {}]  }
   0x1   :  { %7 = vsyncpa [#allocation4], 0 }
   0x2   :  { %9 = vsyncpa [#allocation4 + $0x1], 0  ;;  %s352_s6 = smov 0   ;;  %s354_s7 = smov 0  }
   0x3   :  { %s356_s8 = smov 0   ;;  %s358_s9 = smov 0  }
   0x4 LB: > { %s373_s10 = sadd.s32 4294967295, %s338_s9   ;;  %s184_s11 = sadd.s32 4294967294, %s338_s9   ;;  %s338_s9 = sphi %s358_s9, %s499_s9   ;;  %s334_s8 = sphi %s356_s8, %s498_s8   ;;  %s330_s7 = sphi %s354_s7, %s497_s7   ;;  %s326_s6 = sphi %s352_s6, %s496_s6  }
   0x5   : > { %s377_s12 = sadd.s32 1, %s338_s9   ;;  %s43_s13 = sadd.s32 1, %s334_s8 }
   0x6   : > { %s40_s14 = ssub.s32 %s338_s9, %s377_s12  ;;  %p53_p0 = scmp.ne.s32.totalorder %s334_s8, %s330_s7 }
   0x7   : > { %p41_p1 = scmp.eq.s32.totalorder %s40_s14, 0  ;;  %p54_p2 = scmp.eq.s32.totalorder %s373_s10, 1 }
   0x8   : > { %p59_p3 = scmp.ne.s32.totalorder %s330_s7, %s326_s6  ;;  %p60_p4 = scmp.eq.s32.totalorder %s184_s11, 1 }
   0x9   : > { %s388_s15 = scalar_select %p41_p1, %s334_s8, %s43_s13  }
   0xa   : > { %p390_p5 = por %p54_p2, %p53_p0  ;;  %p394_p6 = por %p60_p4, %p59_p3 }
   0xb   : > { %p185_p7 = scmp.ge.s32.totalorder %s338_s9, 1  ;;  %p67_p8 = scmp.lt.s32.totalorder %s338_s9, 3 }
   0xc   : > { %s487_s16 = scalar_select %p390_p5, 1, 0 }
   0xd   : > { %s488_s17 = scalar_select %p394_p6, 1, 0 }
   0xe   : > { %p484_p9 = scmp.eq.s32.totalorder %s373_s10, 0  ;;  %p401_p10 = pnand %p185_p7, %p67_p8 }
   0xf   : > { %s340_s19 = smov [#allocation2]   ;;  %s244_s24 = scalar_lea.hbm %s482_s0, 128 }
  0x10   : > { %s489_s18 = scalar_select %p401_p10, 1, 0 }
  0x11   : > { %s80_s20 = sshll.u32 %s340_s19, 4  ;;  %p200_p11 = pneg %p401_p10  ;;  %s81_s20 = int_to_ptr.vmem [resolvable:$true] %s80_s20 }
  0x12   : > { %p245_p13 = scmp.ne.s32.totalorder %s482_s0, %s244_s24  ;;  %p251_p3 = scmp.lt.u32.totalorder %s244_s24, %s482_s0 }
  0x13   : > { %p409_p12 = pnand %p484_p9, %p200_p11 }
  0x15   : > { %p246_p0 = pneg %p409_p12 }
  0x17   : > { %p247_p1 = pnand %p246_p0, %p245_p13 }
  0x19   : > { %p248_p2 = pneg %p247_p1 }
  0x1b   : > { %p253_p4 = pnand %p251_p3, %p248_p2 }
  0x1d   : > { %256 = shalt.err (!%p253_p4)
}
  0x1e   : > { %s257_s29 = scalar_lea.vmem %s81_s20, 128  ;;  %p265_p9 = scmp.lt.s32.totalorder %s81_s20, %s81_s20 }
  0x1f   : > { %p258_p7 = scmp.ne.s32.totalorder %s81_s20, %s257_s29  ;;  %p266_p6 = scmp.lt.s32.totalorder %s257_s29, %s257_s29 }
  0x21   : > { %p260_p8 = pnand %p258_p7, %p246_p0  ;;  %p267_p5 = por %p266_p6, %p265_p9 }
  0x23   : > { %p261_p11 = pneg %p260_p8 }
  0x25   : > { %p268_p10 = pnand %p267_p5, %p261_p11 }
  0x27   : > { %271 = shalt.err (!%p268_p10)
}
  0x28   : > { %203 = dma.hbm_to_vmem [thread:$0]  (!%p409_p12), %s482_s0, 128, %s81_s20, [#allocation3]  }
  0x29   : > { %p491_p13 = scmp.ne.s32.totalorder %s489_s18, 0 }
  0x2a   : > { %p492_p1 = scmp.eq.s32.totalorder (!%p491_p13), %s373_s10, 0 }
  0x2b   : > { %93 = sbr.rel (%p491_p13) target bundleno = 77 (0x4d), region = 24 }
  0x32   : > { %317 = dma.done.wait (%p492_p1), [#allocation3], 128   ;;  %p493_p0 = pmov %p492_p1 }
  0x33   : > { %s105_s3 = sand.u32 1, %s330_s7   ;;  %s191_s13 = sshll.u32 %s373_s10, 7  ;;  %v108_v0 = vld [vmem:[#allocation2] sm:$0xff] }
  0x34   : > { %319 = vsyncadd (%p493_p0), [#allocation3], 4294967168  ;;  %s189_s4 = sshll.u32 %s105_s3, 3  ;;  %v109_v1 = vmul.f32 2.0, %v108_v0  ;;  %s442_s19 = scalar_lea.hbm %s483_s1, %s191_s13 }
  0x35   : > { %s107_s5 = scalar_lea.vmem [#allocation5], %s189_s4  ;;  %s112_s20 = scalar_lea.sflag [#allocation4], %s105_s3 }
  0x36   : > { %s125_s11 = sshll.u32 %s107_s5, 4  ;;  %110 = vst [vmem:[%s107_s5] sm:$0xff] %v109_v1  ;;  %p494_p6 = scmp.ne.s32.totalorder %s487_s16, 0  ;;  %s437_s11 = int_to_ptr.vmem [resolvable:$true] %s125_s11 }
  0x37   : > { %s272_s21 = scalar_lea.vmem %s437_s11, 128  ;;  %s341_s10 = smov [#allocation5]  }
  0x38   : > { %p273_p5 = scmp.ne.s32.totalorder %s437_s11, %s272_s21  ;;  %s276_s22 = sshll.u32 %s341_s10, 4  ;;  %s277_s22 = int_to_ptr.vmem [resolvable:$false] %s276_s22 }
  0x39   : > { %s278_s23 = scalar_lea.vmem %s277_s22, 256  ;;  %p279_p12 = scmp.lt.s32.totalorder %s437_s11, %s277_s22 }
  0x3a   : > { %p274_p9 = pnand %p273_p5, %p494_p6  ;;  %p280_p2 = scmp.lt.s32.totalorder %s278_s23, %s272_s21 }
  0x3c   : > { %p275_p10 = pneg %p274_p9  ;;  %p281_p3 = por %p280_p2, %p279_p12 }
  0x3e   : > { %p282_p4 = pnand %p281_p3, %p275_p10 }
  0x40   : > { %285 = shalt.err (!%p282_p4)
}
  0x41   : > { %s286_s24 = scalar_lea.hbm %s442_s19, 128  ;;  %s290_s27 = scalar_lea.hbm %s483_s1, 256 }
  0x42   : > { %p287_p7 = scmp.ne.s32.totalorder %s442_s19, %s286_s24  ;;  %p291_p13 = scmp.lt.u32.totalorder %s442_s19, %s483_s1 }
  0x43   : > { %p292_p1 = scmp.lt.u32.totalorder %s290_s27, %s286_s24  ;;  %p294_p5 = scmp.lt.u32.totalorder %s286_s24, %s442_s19 }
  0x44   : > { %p288_p8 = pnand %p287_p7, %p494_p6 }
  0x45   : > { %p293_p0 = por %p292_p1, %p291_p13 }
  0x46   : > { %p289_p11 = pneg %p288_p8 }
  0x47   : > { %p295_p9 = por %p294_p5, %p293_p0 }
  0x49   : > { %p296_p10 = pnand %p295_p9, %p289_p11 }
  0x4b   : > { %299 = shalt.err (!%p296_p10)
}
  0x4c   : > { %198 = dma.vmem_to_hbm [thread:$0]  (%p494_p6), %s437_s11, 128, %s442_s19, %s112_s20  }
  0x4d PF: > { %p210_p12 = scmp.ge.s32.totalorder %s338_s9, 2  ;;  %s137_s30 = sand.u32 1, %s326_s6  }
  0x4e   : > { %p495_p2 = scmp.ne.s32.totalorder %s488_s17, 0  ;;  %s138_s2 = scalar_lea.sflag [#allocation4], %s137_s30 }
  0x50   : > { %p205_p3 = pnand %p210_p12, %p495_p2 }
  0x52   : > { %321 = dma.done.wait (!%p205_p3), %s138_s2, 128  }
  0x53   : > { %323 = vsyncadd (!%p205_p3), %s138_s2, 4294967168  ;;  %p12_p4 = scmp.ge.s32.totalorder %s377_s12, 4   ;;  %s496_s6 = smov %s330_s7 }
  0x54   : > { %s497_s7 = smov %s334_s8  ;;  %s498_s8 = smov %s388_s15 }
  0x55   : > { %s499_s9 = smov %s377_s12  ;;  %14 = sbr.rel (!%p12_p4) target bundleno = 4 (0x4), region = 61 }
  0x5c   :  { %143 = vsyncpa [#allocation3], 1 }
  0x5d   :  { %145 = vsyncpa [#allocation3 + $0x1], 1 }
  0x5e   :  { %146 = vsyncpa [#allocation4], 1 }
  0x5f   :  { %148 = vsyncpa [#allocation4 + $0x1], 1 }

// kernel: _mlp_forward.1
= control target key start
LH: loop header
LB: loop body
LE: loop exit
PB: predicated region body
PF: predicated region fallthrough
CT: control target
= control target key end

     0   :  { %10 = vsyncpa [#allocation3], 0  ;;  %s524_s0 = inlined_call_operand.hbm [shape: f32[8,32], index: 0, kind: input, shape index: {}]   ;;  %s525_s1 = inlined_call_operand.hbm [shape: bf16[32,128], index: 1, kind: input, shape index: {}]   ;;  %s526_s2 = inlined_call_operand.vmem [shape: f32[1,128], index: 2, kind: input, shape index: {}]   ;;  %s527_s3 = inlined_call_operand.hbm [shape: bf16[128,128], index: 3, kind: input, shape index: {}]   ;;  %s528_s4 = inlined_call_operand.vmem [shape: f32[1,128], index: 4, kind: input, shape index: {}]   ;;  %s529_s5 = inlined_call_operand.hbm [shape: f32[8,128], index: 5, kind: output, shape index: {}]  }
   0x1   :  { %11 = vsyncpa [#allocation6], 0 }
   0x2   :  { %12 = vsyncpa [#allocation4], 0  ;;  %s426_s18 = smov [#allocation5]   ;;  %s332_s22 = scalar_lea.hbm %s525_s1, 256 }
   0x3   :  { %s28_s19 = sshll.u32 %s426_s18, 4  ;;  %p333_p0 = scmp.ne.s32.totalorder %s525_s1, %s332_s22  ;;  %s29_s19 = int_to_ptr.vmem [resolvable:$true] %s28_s19 }
   0x4   :  { %p336_p1 = scmp.lt.u32.totalorder %s332_s22, %s525_s1 }
   0x6   :  { %p338_p2 = pnand %p336_p1, %p333_p0 }
   0x8   :  { %341 = shalt.err (!%p338_p2)
}
   0x9   :  { %s342_s27 = scalar_lea.vmem %s29_s19, 256  ;;  %p347_p4 = scmp.lt.s32.totalorder %s29_s19, %s29_s19 }
   0xa   :  { %p343_p3 = scmp.ne.s32.totalorder %s29_s19, %s342_s27  ;;  %p348_p5 = scmp.lt.s32.totalorder %s342_s27, %s342_s27 }
   0xc   :  { %p349_p6 = por %p348_p5, %p347_p4 }
   0xe   :  { %p350_p7 = pnand %p349_p6, %p343_p3 }
  0x10   :  { %353 = shalt.err (!%p350_p7)
}
  0x11   :  { %s427_s28 = smov 64   ;;  %s428_s29 = smov 4  }
  0x12   :  { %34 = dma.hbm_to_vmem [thread:$0]  %s525_s1, 256, %s29_s19, [#allocation6], %s427_s28, %s427_s28, %s428_s29  }
  0x13   :  { %s429_s7 = smov [#allocation2]   ;;  %s430_s9 = smov [#allocation7]  }
  0x14   :  { %s19_s8 = sshll.u32 %s429_s7, 4  ;;  %s42_s10 = sshll.u32 %s430_s9, 4  ;;  %s20_s8 = int_to_ptr.vmem [resolvable:$true] %s19_s8  ;;  %s43_s10 = int_to_ptr.vmem [resolvable:$true] %s42_s10 }
  0x15   :  { %s354_s13 = scalar_lea.hbm %s524_s0, 128 }
  0x16   :  { %p355_p8 = scmp.ne.s32.totalorder %s524_s0, %s354_s13  ;;  %p358_p9 = scmp.lt.u32.totalorder %s354_s13, %s524_s0 }
  0x18   :  { %p360_p10 = pnand %p358_p9, %p355_p8 }
  0x1a   :  { %363 = shalt.err (!%p360_p10)
}
  0x1b   :  { %s364_s1 = scalar_lea.vmem %s20_s8, 128  ;;  %p369_p12 = scmp.lt.s32.totalorder %s20_s8, %s20_s8 }
  0x1c   :  { %p365_p11 = scmp.ne.s32.totalorder %s20_s8, %s364_s1  ;;  %p370_p13 = scmp.lt.s32.totalorder %s364_s1, %s364_s1 }
  0x1e   :  { %p371_p0 = por %p370_p13, %p369_p12 }
  0x20   :  { %p372_p1 = pnand %p371_p0, %p365_p11 }
  0x22   :  { %375 = shalt.err (!%p372_p1)
}
  0x23   :  { %22 = dma.hbm_to_vmem [thread:$0]  %s524_s0, 128, %s20_s8, [#allocation3]  }
  0x24   :  { %s376_s22 = scalar_lea.hbm %s527_s3, 1024 }
  0x25   :  { %p377_p2 = scmp.ne.s32.totalorder %s527_s3, %s376_s22  ;;  %p380_p3 = scmp.lt.u32.totalorder %s376_s22, %s527_s3 }
  0x27   :  { %p382_p4 = pnand %p380_p3, %p377_p2 }
  0x29   :  { %385 = shalt.err (!%p382_p4)
}
  0x2a   :  { %s386_s27 = scalar_lea.vmem %s43_s10, 1024  ;;  %p391_p6 = scmp.lt.s32.totalorder %s43_s10, %s43_s10 }
  0x2b   :  { %p387_p5 = scmp.ne.s32.totalorder %s43_s10, %s386_s27  ;;  %p392_p7 = scmp.lt.s32.totalorder %s386_s27, %s386_s27 }
  0x2d   :  { %p393_p8 = por %p392_p7, %p391_p6 }
  0x2f   :  { %p394_p9 = pnand %p393_p8, %p387_p5 }
  0x31   :  { %397 = shalt.err (!%p394_p9)
}
  0x32   :  { %48 = dma.hbm_to_vmem [thread:$0]  %s527_s3, 1024, %s43_s10, [#allocation6], %s427_s28, %s427_s28, %s428_s29  }
  0x33   :  { %420 = dma.done.wait [#allocation3], 128  }
  0x34   :  { %421 = vsyncadd [#allocation3], 4294967168 }
  0x35   :  { %422 = dma.done.wait [#allocation6], 1280  }
  0x36   :  { %423 = vsyncadd [#allocation6], 4294966016  ;;  %v431_v0 = vmov 0.0   ;;  %vm432_vm0 = vmmov 0   ;;  %v322_v1 = vld [vmem:[#allocation5] sm:$0xff]   ;;  %v323_v2 = vld [vmem:[#allocation5 + $0x8] sm:$0xff]  }
  0x37   :  { %286 = vmatprep.subr.bf16.mxu0 %v431_v0  ;;  %290 = vmatprep.mubr.msk.bf16.mxu0 %vm432_vm0, %v431_v0  ;;  %v61_v3 = vld [vmem:[#allocation2] sm:$0xff]  ;;  %v324_v4 = vld [vmem:[#allocation7] sm:$0xff]   ;;  %vm86_vm1 = vcmask 261120   ;;  %v326_v7 = vld [vmem:[#allocation7 + $0x10] sm:$0xff]   ;;  %s433_s7 = smov [#allocation8]  }
  0x38   :  { %294 = vmatprep.subr.bf16.mxu1 %v431_v0  ;;  %310 = vmatprep.mubr.msk.bf16.mxu1 %vm432_vm0, %v431_v0  ;;  %v67_v5 = vpack.c.bf16 %v61_v3, %v61_v3  ;;  %v325_v6 = vld [vmem:[#allocation7 + $0x8] sm:$0xff]   ;;  %v327_v8 = vld [vmem:[#allocation7 + $0x18] sm:$0xff]   ;;  %v328_v9 = vld [vmem:[#allocation7 + $0x20] sm:$0xff]   ;;  %s251_s8 = sshll.u32 %s433_s7, 4  ;;  %s252_s8 = int_to_ptr.vmem [resolvable:$true] %s251_s8 }
  0x39   :  { %287 = vmatpush3.bf16.msra.mxu0 %v322_v1  ;;  %295 = vmatpush3.bf16.msra.mxu1 %v324_v4  ;;  %v329_v10 = vld [vmem:[#allocation7 + $0x28] sm:$0xff]   ;;  %v330_v11 = vld [vmem:[#allocation7 + $0x30] sm:$0xff]   ;;  %v331_v12 = vld [vmem:[#allocation7 + $0x38] sm:$0xff]   ;;  %p403_p11 = scmp.lt.s32.totalorder %s252_s8, %s252_s8 }
  0x3a   :  { %288 = vmatprep.subr.bf16.mxu0 %v431_v0  ;;  %296 = vmatprep.subr.bf16.mxu1 %v431_v0  ;;  %v261_v13 = vld [vmem:[%s526_s2] ss:$0 sm:$0xff]  ;;  %s398_s2 = scalar_lea.vmem %s252_s8, 128 }
  0x3b   :  { %v265_v21 = vld [vmem:[%s528_s4] ss:$0 sm:$0xff]  ;;  %p399_p10 = scmp.ne.s32.totalorder %s252_s8, %s398_s2  ;;  %p404_p12 = scmp.lt.s32.totalorder %s398_s2, %s398_s2 }
  0x3d   :  { %289 = vmatpush3.bf16.msra.mxu0 %v323_v2  ;;  %297 = vmatpush3.bf16.msra.mxu1 %v325_v6  ;;  %p405_p13 = por %p404_p12, %p403_p11 }
  0x3e   :  { %298 = vmatprep.subr.bf16.mxu1 %v431_v0 }
  0x3f   :  { %p406_p0 = pnand %p405_p13, %p399_p10 }
  0x40   :  { %291 = vmatmul.mubr.msk.bf16.vlgmr.msra.gmra.mrb[0].mxu0 %vm86_vm1, %v67_v5 }
  0x41   :  { %299 = vmatpush3.bf16.msra.mxu1 %v326_v7 }
  0x42   :  { %300 = vmatprep.subr.bf16.mxu1 %v431_v0 }
  0x45   :  { %301 = vmatpush3.bf16.msra.mxu1 %v327_v8 }
  0x46   :  { %302 = vmatprep.subr.bf16.mxu1 %v431_v0 }
  0x49   :  { %303 = vmatpush3.bf16.msra.mxu1 %v328_v9 }
  0x4a   :  { %304 = vmatprep.subr.bf16.mxu1 %v431_v0 }
  0x4d   :  { %305 = vmatpush3.bf16.msra.mxu1 %v329_v10 }
  0x4e   :  { %306 = vmatprep.subr.bf16.mxu1 %v431_v0 }
  0x51   :  { %307 = vmatpush3.bf16.msra.mxu1 %v330_v11 }
  0x52   :  { %308 = vmatprep.subr.bf16.mxu1 %v431_v0 }
  0x55   :  { %309 = vmatpush3.bf16.msra.mxu1 %v331_v12 }
 0x113   :  { %v124_v14 = vpop.f32.mrb[0].mxu0 }
 0x114   :  { %v125_v15 = vadd.f32 %v261_v13, %v124_v14  ;;  %v292_v16 = vpop.f32.mrb[1].mxu0 }
 0x115   :  { %v127_v17 = vpop.f32.mrb[2].mxu0 }
 0x116   :  { %v130_v18 = vmax.f32 %v125_v15, 0.0  ;;  %v293_v19 = vpop.f32.mrb[3].mxu0 }
 0x118   :  { %v148_v20 = vpack.c.bf16 %v130_v18, %v130_v18 }
 0x11a   :  { %311 = vmatmul.mubr.bf16.vlgmr.msra.gmra.mrb[0].mxu1 %v148_v20 }
 0x1ed   :  { %v237_v22 = vpop.f32.mrb[0].mxu1 }
 0x1ee   :  { %v238_v23 = vadd.f32 %v265_v21, %v237_v22  ;;  %v312_v24 = vpop.f32.mrb[1].mxu1 }
 0x1ef   :  { %v240_v25 = vpop.f32.mrb[2].mxu1 }
 0x1f0   :  { %v243_v26 = vmax.f32 %v238_v23, 0.0  ;;  %v313_v27 = vpop.f32.mrb[3].mxu1 }
 0x1f2   :  { %244 = vst [vmem:[#allocation8] sm:$0xff] %v243_v26 }
 0x1f3   :  { %409 = shalt.err (!%p406_p0)
}
 0x1f4   :  { %s410_s4 = scalar_lea.hbm %s529_s5, 128 }
 0x1f5   :  { %p411_p1 = scmp.ne.s32.totalorder %s529_s5, %s410_s4  ;;  %p414_p2 = scmp.lt.u32.totalorder %s410_s4, %s529_s5 }
 0x1f7   :  { %p416_p3 = pnand %p414_p2, %p411_p1 }
 0x1f9   :  { %419 = shalt.err (!%p416_p3)
}
 0x1fa   :  { %254 = dma.vmem_to_hbm [thread:$0]  %s252_s8, 128, %s529_s5, [#allocation4]  }
 0x1fb   :  { %424 = dma.done.wait [#allocation4], 128  }
 0x1fc   :  { %425 = vsyncadd [#allocation4], 4294967168 }
 0x1fd   :  { %258 = vsyncpa [#allocation3], 1 }
 0x1fe   :  { %259 = vsyncpa [#allocation6], 1 }
 0x1ff   :  { %260 = vsyncpa [#allocation4], 1 }

</bundles_post_ra>
